<compile_context>
chip_gen: v6e
topology: v6e:2x2x1
jax: 0.10.0
libtpu: 0.0.40
codegen_flags: <defaults>
</compile_context>

<pallas_src>
import jax
import jax.numpy as jnp
from jax.experimental import pallas as pl
from jax.experimental.pallas import tpu as pltpu


def _round_up(n, m):
    return -(-n // m) * m


# ---------------------------------------------------------------------------
# Fused Pallas kernel
# ---------------------------------------------------------------------------
def _make_fused_mlp_kernel(n_hidden, has_output):
    """Kernel fusing (Linear+BN+ReLU) * n_hidden [+ final Linear] per batch tile.

    Ref layout: x, (w_i, shift_i) * n_hidden, [w_out_row, b_out], o
    """

    def kernel(*refs):
        x_ref = refs[0]
        o_ref = refs[-1]
        h = x_ref[...]                              # bf16 activations (TB, in_dim)
        idx = 1
        for li in range(n_hidden):
            w_ref = refs[idx]
            s_ref = refs[idx + 1]
            idx += 2
            # bf16 MXU matmul, f32 accumulation; BN + bias pre-folded into w/shift.
            y = jnp.dot(h, w_ref[...], preferred_element_type=jnp.float32)
            a = jnp.maximum(y + s_ref[...], 0.0)    # f32 epilogue (v5e VPU-safe)
            last_hidden = li == n_hidden - 1
            # Keep activations bf16 between layers (next matmul truncates anyway);
            # only the final no-output-layer result stays f32.
            h = a if (last_hidden and not has_output) else a.astype(jnp.bfloat16)
            # TODO(synk): Dropout is identity in eval mode; training-mode dropout
            # and training-mode BN batch statistics are not implemented.
        if has_output:
            w_ref = refs[idx]                       # (1, K) f32 row weight
            b_ref = refs[idx + 1]                   # (1, 1) f32 bias
            # Final (K,1) projection on VPU + XLU lane-reduce (MXU would be 127/128
            # zeros); result is a dense (TB, 1) f32 column -> no lane-padded slab.
            y = jnp.sum(h.astype(jnp.float32) * w_ref[...], axis=-1, keepdims=True)
            h = y + b_ref[...]
        o_ref[...] = h.astype(o_ref.dtype)

    return kernel


def mlp_forward_pallas(fused, x, *, tb_cap=512):
    """Single batch-tiled pallas_call for the whole MLP. `fused` from fold_params()."""
    n_hidden = len(fused["hidden_w"])
    has_out = fused["out_w"] is not None
    B, in_dim = x.shape

    # Batch tile: >=512 rows for pipelining at scale; multiple of 16 so bf16
    # sublane packing is legal even for partial/padded tiles.
    TB = tb_cap if B >= tb_cap else _round_up(B, 16)

    # Feed x as bf16: layer 1 downcasts anyway, and this halves input HBM traffic.
    x_bf16 = x.astype(jnp.bfloat16)

    inputs = [x_bf16]
    in_specs = [pl.BlockSpec((TB, in_dim), lambda i: (i, 0))]
    for w, s in zip(fused["hidden_w"], fused["hidden_shift"]):
        inputs += [w, s]
        # Constant block index -> weights/shifts stay VMEM-resident across tiles.
        in_specs += [pl.BlockSpec(w.shape, lambda i: (0, 0)),
                     pl.BlockSpec(s.shape, lambda i: (0, 0))]
    if has_out:
        inputs += [fused["out_w"], fused["out_b"]]
        in_specs += [pl.BlockSpec(fused["out_w"].shape, lambda i: (0, 0)),
                     pl.BlockSpec(fused["out_b"].shape, lambda i: (0, 0))]
        out_cols = 1
    else:
        out_cols = fused["hidden_w"][-1].shape[1]

    kernel = _make_fused_mlp_kernel(n_hidden, has_out)
    out = pl.pallas_call(
        kernel,
        out_shape=jax.ShapeDtypeStruct((B, out_cols), jnp.float32),
        grid=(pl.cdiv(B, TB),),
        in_specs=in_specs,
        out_specs=pl.BlockSpec((TB, out_cols), lambda i: (i, 0)),
        compiler_params=pltpu.CompilerParams(
            # Independent batch tiles -> shard across v7x's two TensorCores.
            dimension_semantics=("parallel",),
            # Explicit VMEM budget; tiny footprint, safe on v7x's 64 MiB VMEM.
            vmem_limit_bytes=32 * 1024 * 1024,
        ),
    )(*inputs)
    return out


# ---------------------------------------------------------------------------
# Parameter setup + one-time folding (plain JAX glue, done once at init)
# ---------------------------------------------------------------------------
def init_mlp_params(key, input_dim, embed_dims, output_layer=True, eps=1e-5):
    """Deterministic synthetic parameters matching the torch module's shapes."""
    params = {"hidden": [], "out": None, "eps": eps}
    in_dim = input_dim
    for embed_dim in embed_dims:
        key, kw, kb, kg, kbeta, km, kv = jax.random.split(key, 7)
        bound = 1.0 / jnp.sqrt(jnp.float32(in_dim))
        w = jax.random.uniform(kw, (in_dim, embed_dim), jnp.float32, -bound, bound)
        b = jax.random.uniform(kb, (1, embed_dim), jnp.float32, -bound, bound)
        gamma = 1.0 + 0.1 * jax.random.normal(kg, (1, embed_dim), jnp.float32)
        beta = 0.1 * jax.random.normal(kbeta, (1, embed_dim), jnp.float32)
        running_mean = 0.1 * jax.random.normal(km, (1, embed_dim), jnp.float32)
        running_var = jax.random.uniform(kv, (1, embed_dim), jnp.float32, 0.5, 1.5)
        params["hidden"].append(
            dict(w=w, b=b, gamma=gamma, beta=beta, mean=running_mean, var=running_var)
        )
        in_dim = embed_dim
    if output_layer:
        key, kw, kb = jax.random.split(key, 3)
        bound = 1.0 / jnp.sqrt(jnp.float32(in_dim))
        w = jax.random.uniform(kw, (in_dim, 1), jnp.float32, -bound, bound)
        b = jax.random.uniform(kb, (1, 1), jnp.float32, -bound, bound)
        params["out"] = dict(w=w, b=b)
    return params


def fold_params(params):
    """Fold BN(eval)+bias into weights/shifts once; cast hidden weights to bf16."""
    eps = params["eps"]
    hidden_w, hidden_shift = [], []
    for layer in params["hidden"]:
        inv_std = 1.0 / jnp.sqrt(layer["var"] + eps)
        scale = layer["gamma"] * inv_std                                  # (1, N)
        hidden_w.append((layer["w"] * scale).astype(jnp.bfloat16))        # fold scale
        hidden_shift.append(
            ((layer["b"] - layer["mean"]) * scale + layer["beta"]).astype(jnp.float32)
        )
    out_w = out_b = None
    if params["out"] is not None:
        # Final projection kept f32 as a (1, K) row for the VPU broadcast-multiply.
        out_w = params["out"]["w"].reshape(1, -1).astype(jnp.float32)     # (1, K)
        out_b = params["out"]["b"].astype(jnp.float32)                    # (1, 1)
    return dict(hidden_w=hidden_w, hidden_shift=hidden_shift, out_w=out_w, out_b=out_b)


# ---------------------------------------------------------------------------
# Pure-JAX references
# ---------------------------------------------------------------------------
def mlp_forward_ref(params, x):
    """Original f32 semantics (Linear -> BN(eval) -> ReLU)* -> Linear."""
    eps = params["eps"]
    hi = jax.lax.Precision.HIGHEST
    h = x
    for layer in params["hidden"]:
        y = jnp.dot(h, layer["w"], precision=hi) + layer["b"]
        y = (y - layer["mean"]) / jnp.sqrt(layer["var"] + eps) * layer["gamma"] + layer["beta"]
        h = jnp.maximum(y, 0.0)
    if params["out"] is not None:
        h = jnp.dot(h, params["out"]["w"], precision=hi) + params["out"]["b"]
    return h


def mlp_forward_fused_ref(fused, x):
    """Reference using the same folded bf16 weights (tight check of kernel logic)."""
    hi = jax.lax.Precision.HIGHEST
    n_hidden = len(fused["hidden_w"])
    has_out = fused["out_w"] is not None
    h = x.astype(jnp.bfloat16)
    for li, (w, s) in enumerate(zip(fused["hidden_w"], fused["hidden_shift"])):
        y = jnp.dot(h.astype(jnp.float32), w.astype(jnp.float32), precision=hi)
        a = jnp.maximum(y + s, 0.0)
        h = a if (li == n_hidden - 1 and not has_out) else a.astype(jnp.bfloat16)
    if has_out:
        h = jnp.sum(h.astype(jnp.float32) * fused["out_w"], axis=-1, keepdims=True) + fused["out_b"]
    return h


# ---------------------------------------------------------------------------
if __name__ == "__main__":
    key = jax.random.PRNGKey(0)
    input_dim = 32
    embed_dims = (64, 32)
    dropout = 0.2  # identity in eval mode

    key, kp = jax.random.split(key)
    params = init_mlp_params(kp, input_dim, embed_dims, output_layer=True)
    fused = fold_params(params)          # one-time fold, outside the per-call path

    # Small shape (single tile).
    key, kx = jax.random.split(key)
    x = jax.random.normal(kx, (8, input_dim), jnp.float32)
    out = jax.block_until_ready(mlp_forward_pallas(fused, x))
    assert out.shape == (8, 1), out.shape

    # Tight check: same folded bf16 weights, pure-JAX math.
    ref_fused = mlp_forward_fused_ref(fused, x)
    assert jnp.allclose(out, ref_fused, atol=1e-3, rtol=1e-3), "mismatch vs fused reference"

    # Semantics check vs original f32 module math (loosened for bf16 operands).
    ref_full = mlp_forward_ref(params, x)
    assert jnp.allclose(out, ref_full, atol=5e-2, rtol=5e-2), "mismatch vs f32 reference"

    # Exercise the batch-tiled grid: multiple tiles + ragged last tile.
    key, kx2 = jax.random.split(key)
    x_big = jax.random.normal(kx2, (272, input_dim), jnp.float32)
    out_big = jax.block_until_ready(mlp_forward_pallas(fused, x_big, tb_cap=128))
    assert out_big.shape == (272, 1), out_big.shape
    ref_big = mlp_forward_fused_ref(fused, x_big)
    assert jnp.allclose(out_big, ref_big, atol=1e-3, rtol=1e-3), "mismatch on tiled batch"

    print("KERNEL_OK")
</pallas_src>

<mosaic_0001>
module attributes {stable_mosaic.version = 11 : i64} {
  func.func @kernel(%arg0: i32, %arg1: memref<16x32xbf16, #tpu.memory_space<vmem>>, %arg2: memref<32x64xbf16, #tpu.memory_space<vmem>>, %arg3: memref<1x64xf32, #tpu.memory_space<vmem>>, %arg4: memref<64x32xbf16, #tpu.memory_space<vmem>>, %arg5: memref<1x32xf32, #tpu.memory_space<vmem>>, %arg6: memref<1x32xf32, #tpu.memory_space<vmem>>, %arg7: memref<1x1xf32, #tpu.memory_space<vmem>>, %arg8: memref<16x1xf32, #tpu.memory_space<vmem>>) attributes {dimension_semantics = [#tpu.dimension_semantics<parallel>], iteration_bounds = array<i64: 1>, scalar_prefetch = 0 : i64, scratch_operands = 0 : i64, tpu.core_type = #tpu.core_type<tc>, window_params = [{transform_indices = @transform_0, window_bounds = array<i64: 16, 32>}, {pipeline_mode = #tpu.pipeline_mode<synchronous>, transform_indices = @transform_1, window_bounds = array<i64: 32, 64>}, {pipeline_mode = #tpu.pipeline_mode<synchronous>, transform_indices = @transform_2, window_bounds = array<i64: 1, 64>}, {pipeline_mode = #tpu.pipeline_mode<synchronous>, transform_indices = @transform_3, window_bounds = array<i64: 64, 32>}, {pipeline_mode = #tpu.pipeline_mode<synchronous>, transform_indices = @transform_4, window_bounds = array<i64: 1, 32>}, {pipeline_mode = #tpu.pipeline_mode<synchronous>, transform_indices = @transform_5, window_bounds = array<i64: 1, 32>}, {pipeline_mode = #tpu.pipeline_mode<synchronous>, transform_indices = @transform_6, window_bounds = array<i64: 1, 1>}, {transform_indices = @transform_7, window_bounds = array<i64: 16, 1>}]} {
    %c0 = arith.constant 0 : index
    %c0_0 = arith.constant 0 : index
    %0 = vector.load %arg1[%c0, %c0_0] : memref<16x32xbf16, #tpu.memory_space<vmem>>, vector<16x32xbf16>
    %c0_1 = arith.constant 0 : index
    %c0_2 = arith.constant 0 : index
    %1 = vector.load %arg2[%c0_1, %c0_2] : memref<32x64xbf16, #tpu.memory_space<vmem>>, vector<32x64xbf16>
    %cst = arith.constant dense<0.000000e+00> : vector<16x64xf32>
    %2 = tpu.matmul %0, %1, %cst {dimension_numbers = #tpu.dot_dimension_numbers<[1], [0], [0], [1], [0, 0, 1, 1], [], []>} : vector<16x32xbf16>, vector<32x64xbf16>, vector<16x64xf32> -> vector<16x64xf32>
    %c0_3 = arith.constant 0 : index
    %c0_4 = arith.constant 0 : index
    %3 = vector.load %arg3[%c0_3, %c0_4] : memref<1x64xf32, #tpu.memory_space<vmem>>, vector<1x64xf32>
    %4 = vector.broadcast %3 : vector<1x64xf32> to vector<16x64xf32>
    %5 = arith.addf %2, %4 : vector<16x64xf32>
    %cst_5 = arith.constant 0.000000e+00 : f32
    %6 = vector.broadcast %cst_5 : f32 to vector<16x64xf32>
    %7 = arith.maximumf %5, %6 : vector<16x64xf32>
    %8 = arith.truncf %7 : vector<16x64xf32> to vector<16x64xbf16>
    %c0_6 = arith.constant 0 : index
    %c0_7 = arith.constant 0 : index
    %9 = vector.load %arg4[%c0_6, %c0_7] : memref<64x32xbf16, #tpu.memory_space<vmem>>, vector<64x32xbf16>
    %cst_8 = arith.constant dense<0.000000e+00> : vector<16x32xf32>
    %10 = tpu.matmul %8, %9, %cst_8 {dimension_numbers = #tpu.dot_dimension_numbers<[1], [0], [0], [1], [0, 0, 1, 1], [], []>} : vector<16x64xbf16>, vector<64x32xbf16>, vector<16x32xf32> -> vector<16x32xf32>
    %c0_9 = arith.constant 0 : index
    %c0_10 = arith.constant 0 : index
    %11 = vector.load %arg5[%c0_9, %c0_10] : memref<1x32xf32, #tpu.memory_space<vmem>>, vector<1x32xf32>
    %12 = vector.broadcast %11 : vector<1x32xf32> to vector<16x32xf32>
    %13 = arith.addf %10, %12 : vector<16x32xf32>
    %cst_11 = arith.constant 0.000000e+00 : f32
    %14 = vector.broadcast %cst_11 : f32 to vector<16x32xf32>
    %15 = arith.maximumf %13, %14 : vector<16x32xf32>
    %16 = arith.truncf %15 : vector<16x32xf32> to vector<16x32xbf16>
    %17 = arith.extf %16 : vector<16x32xbf16> to vector<16x32xf32>
    %c0_12 = arith.constant 0 : index
    %c0_13 = arith.constant 0 : index
    %18 = vector.load %arg6[%c0_12, %c0_13] : memref<1x32xf32, #tpu.memory_space<vmem>>, vector<1x32xf32>
    %19 = vector.broadcast %18 : vector<1x32xf32> to vector<16x32xf32>
    %20 = arith.mulf %17, %19 : vector<16x32xf32>
    %cst_14 = arith.constant dense<0.000000e+00> : vector<16xf32>
    %21 = vector.multi_reduction <add>, %20, %cst_14 [1] : vector<16x32xf32> to vector<16xf32>
    %22 = vector.shape_cast %21 : vector<16xf32> to vector<16x1xf32>
    %c0_15 = arith.constant 0 : index
    %c0_16 = arith.constant 0 : index
    %23 = vector.load %arg7[%c0_15, %c0_16] : memref<1x1xf32, #tpu.memory_space<vmem>>, vector<1x1xf32>
    %24 = vector.broadcast %23 : vector<1x1xf32> to vector<16x1xf32>
    %25 = arith.addf %22, %24 : vector<16x1xf32>
    %c0_17 = arith.constant 0 : index
    %c0_18 = arith.constant 0 : index
    %26 = vector.load %arg8[%c0_17, %c0_18] : memref<16x1xf32, #tpu.memory_space<vmem>>, vector<16x1xf32>
    tpu.vector_store %arg8[%c0_17, %c0_18], %25 {strides = array<i32>} : memref<16x1xf32, #tpu.memory_space<vmem>>, vector<16x1xf32>,
    return
  }
  func.func @transform_0(%arg0: i32) -> (i32, i32) {
    %c0_i32 = arith.constant 0 : i32
    %c0_i32_0 = arith.constant 0 : i32
    return %arg0, %c0_i32 : i32, i32
  }
  func.func @transform_1(%arg0: i32) -> (i32, i32) {
    %c0_i32 = arith.constant 0 : i32
    %c0_i32_0 = arith.constant 0 : i32
    %c0_i32_1 = arith.constant 0 : i32
    return %c0_i32, %c0_i32_0 : i32, i32
  }
  func.func @transform_2(%arg0: i32) -> (i32, i32) {
    %c0_i32 = arith.constant 0 : i32
    %c0_i32_0 = arith.constant 0 : i32
    %c0_i32_1 = arith.constant 0 : i32
    return %c0_i32, %c0_i32_0 : i32, i32
  }
  func.func @transform_3(%arg0: i32) -> (i32, i32) {
    %c0_i32 = arith.constant 0 : i32
    %c0_i32_0 = arith.constant 0 : i32
    %c0_i32_1 = arith.constant 0 : i32
    return %c0_i32, %c0_i32_0 : i32, i32
  }
  func.func @transform_4(%arg0: i32) -> (i32, i32) {
    %c0_i32 = arith.constant 0 : i32
    %c0_i32_0 = arith.constant 0 : i32
    %c0_i32_1 = arith.constant 0 : i32
    return %c0_i32, %c0_i32_0 : i32, i32
  }
  func.func @transform_5(%arg0: i32) -> (i32, i32) {
    %c0_i32 = arith.constant 0 : i32
    %c0_i32_0 = arith.constant 0 : i32
    %c0_i32_1 = arith.constant 0 : i32
    return %c0_i32, %c0_i32_0 : i32, i32
  }
  func.func @transform_6(%arg0: i32) -> (i32, i32) {
    %c0_i32 = arith.constant 0 : i32
    %c0_i32_0 = arith.constant 0 : i32
    %c0_i32_1 = arith.constant 0 : i32
    return %c0_i32, %c0_i32_0 : i32, i32
  }
  func.func @transform_7(%arg0: i32) -> (i32, i32) {
    %c0_i32 = arith.constant 0 : i32
    %c0_i32_0 = arith.constant 0 : i32
    return %arg0, %c0_i32 : i32, i32
  }
}

</mosaic_0001>

<bundles_post_ra>
// kernel: tpu_custom_call.1
= control target key start
LH: loop header
LB: loop body
LE: loop exit
PB: predicated region body
PF: predicated region fallthrough
CT: control target
= control target key end

     0   :  { %s395_s0 = inlined_call_operand.vmem [shape: bf16[8,32], index: 0, kind: input, shape index: {}]   ;;  %s396_s1 = inlined_call_operand.vmem [shape: bf16[32,64], index: 1, kind: input, shape index: {}]   ;;  %s397_s2 = inlined_call_operand.vmem [shape: f32[1,64], index: 2, kind: input, shape index: {}]   ;;  %s398_s3 = inlined_call_operand.vmem [shape: bf16[64,32], index: 3, kind: input, shape index: {}]   ;;  %s399_s4 = inlined_call_operand.vmem [shape: f32[1,32], index: 4, kind: input, shape index: {}]   ;;  %s400_s5 = inlined_call_operand.vmem [shape: f32[1,32], index: 5, kind: input, shape index: {}]   ;;  %s401_s6 = inlined_call_operand.<no memory space> [shape: f32[1,1], index: 6, kind: input, shape index: {}]   ;;  %s402_s7 = inlined_call_operand.vmem [shape: f32[8,1], index: 7, kind: output, shape index: {}]  }
   0x1   :  { %v12_v0 = vstv %s401_s6 }
   0x2   :  { %13 = vst [vmem:[#allocation2] sm:$0x1] %v12_v0 }
   0x3   :  { %v307_v1 = vld [vmem:[%s396_s1 + $0x8] sm:$0xff]   ;;  %v314_v2 = vmov 0.0   ;;  %v308_v3 = vld [vmem:[%s396_s1] sm:$0xff]   ;;  %vm315_vm0 = vmmov 0   ;;  %v310_v4 = vld [vmem:[%s398_s3 + $0x18] sm:$0xff]   ;;  %vm59_vm1 = vcmask 261120  }
   0x4   :  { %285 = vmatprep.subr.bf16.mxu0 %v314_v2  ;;  %293 = vmatprep.subr.bf16.mxu1 %v314_v2  ;;  %v309_v5 = vld [vmem:[%s395_s0] sm:$0xff]   ;;  %v311_v6 = vld [vmem:[%s398_s3 + $0x10] sm:$0xff]   ;;  %v312_v7 = vld [vmem:[%s398_s3 + $0x8] sm:$0xff]   ;;  %vm146_vm2 = vcmask 523264   ;;  %vm220_vm3 = vcmask 7168  }
   0x5   :  { %286 = vmatpush3.bf16.msra.mxu0 %v307_v1  ;;  %289 = vmatprep.mubr.msk.bf16.mxu0 %vm315_vm0, %v314_v2  ;;  %v313_v8 = vld [vmem:[%s398_s3] sm:$0xff]  }
   0x6   :  { %287 = vmatprep.subr.bf16.mxu0 %v314_v2  ;;  %301 = vmatprep.mubr.msk.bf16.mxu1 %vm315_vm0, %v314_v2  ;;  %v264_v9 = vld [vmem:[%s397_s2] ss:$0 sm:$0xff] }
   0x7   :  { %294 = vmatpush3.bf16.msra.mxu1 %v310_v4  ;;  %v269_v19 = vld [vmem:[%s399_s4] ss:$0 sm:$0xff] }
   0x8   :  { %295 = vmatprep.subr.bf16.mxu1 %v314_v2  ;;  %v275_v29 = vld [vmem:[%s400_s5] ss:$0 sm:$0xff] }
   0x9   :  { %288 = vmatpush3.bf16.msra.mxu0 %v308_v3  ;;  %v276_v36 = vld [vmem:[#allocation2] ss:$0 sm:$0xff] }
   0xb   :  { %296 = vmatpush3.bf16.msra.mxu1 %v311_v6 }
   0xc   :  { %290 = vmatmul.mubr.msk.bf16.vlgmr.msra.gmra.mxu0 %vm59_vm1, %v309_v5  ;;  %297 = vmatprep.subr.bf16.mxu1 %v314_v2 }
   0xf   :  { %298 = vmatpush3.bf16.msra.mxu1 %v312_v7 }
  0x10   :  { %299 = vmatprep.subr.bf16.mxu1 %v314_v2 }
  0x13   :  { %300 = vmatpush3.bf16.msra.mxu1 %v313_v8 }
  0xcc   :  { %v97_v10 = vpop.f32.mrf.mxu0 }
  0xcd   :  { %v98_v12 = vadd.f32 %v264_v9, %v97_v10 }
  0xce   :  { %v291_v11 = vpop.f32.mrf.mxu0 }
  0xcf   :  { %v104_v16 = vmax.f32 %v98_v12, 0.0 }
  0xd0   :  { %v100_v13 = vpop.f32.mrf.mxu0 }
  0xd1   :  { %v101_v14 = vadd.f32 %v264_v9, %v100_v13 }
  0xd2   :  { %v292_v15 = vpop.f32.mrf.mxu0 }
  0xd3   :  { %v105_v17 = vmax.f32 %v101_v14, 0.0 }
  0xd5   :  { %v106_v18 = vpack.c.bf16 %v105_v17, %v104_v16 }
  0xd7   :  { %302 = vmatmul.mubr.msk.bf16.vlgmr.msra.gmra.mxu1 %vm146_vm2, %v106_v18 }
 0x197   :  { %v184_v20 = vpop.f32.mrf.mxu1 }
 0x198   :  { %v185_v22 = vadd.f32 %v269_v19, %v184_v20 }
 0x199   :  { %v303_v21 = vpop.f32.mrf.mxu1 }
 0x19a   :  { %v191_v26 = vmax.f32 %v185_v22, 0.0 }
 0x19b   :  { %v187_v23 = vpop.f32.mrf.mxu1 }
 0x19c   :  { %v188_v24 = vadd.f32 %v269_v19, %v187_v23 }
 0x19d   :  { %v304_v25 = vpop.f32.mrf.mxu1 }
 0x19e   :  { %v192_v27 = vmax.f32 %v188_v24, 0.0 }
 0x1a0   :  { %v193_v28 = vpack.c.bf16 %v192_v27, %v191_v26 }
 0x1a2   :  { %v194_v30 = vunpack.c.l.bf16 %v193_v28  ;;  %v195_v31 = vunpack.c.h.bf16 %v193_v28 }
 0x1a4   :  { %v203_v32 = vmul.f32 %v275_v29, %v194_v30  ;;  %v204_v34 = vmul.f32 %v275_v29, %v195_v31 }
 0x1a6   :  { %v205_v33 = vsel %vm59_vm1, %v203_v32, 0.0  ;;  %v208_v35 = vsel %vm59_vm1, %v204_v34, 0.0 }
 0x1a7   :  { %206 = vadd.xlane.f32.xlu0 %v205_v33 }
 0x1ab   :  { %209 = vadd.xlane.f32.xlu0 %v208_v35 }
 0x230   :  { %v207_v37 = vpop.xlane.xlu0 %206 }
 0x231   :  { %v218_v38 = vadd.f32 %v276_v36, %v207_v37 }
 0x233   :  { %221 = vst.msk [vmem:[#allocation3] sm:$0xff] %vm220_vm3, %v218_v38 }
 0x234   :  { %v210_v39 = vpop.xlane.xlu0 %209 }
 0x23a   :  { %v253_v40 = vld [vmem:[#allocation3] sm:$0xff] }
 0x23b   :  { %254 = vst [vmem:[%s402_s7] sm:$0xff] %v253_v40 }

</bundles_post_ra>
